<compile_context>
chip_gen: v7x
topology: tpu7x:2x2x1
jax: 0.10.0
libtpu: 0.0.40
codegen_flags: <defaults>
</compile_context>

<pallas_src>
import functools
import math

import jax
import jax.numpy as jnp
from jax.experimental import pallas as pl
from jax.experimental.pallas import tpu as pltpu


def _rotary_kernel(coords_ref, pat_ref, out_ref, *, dim):
    # coords_ref: (TB, N)       raw coordinates (scaling folded into pattern)
    # pat_ref:    (1,  N*dim)   tile(concat([inv, inv]) * scale/min_freq, N)
    # out_ref:    (TB, N*dim)   flattened (N, dim) frequencies, lane-dense
    t = coords_ref[...]
    tb, n = t.shape
    # Expand each coordinate across `dim` consecutive lanes so the output is
    # stored as one wide, unmasked, lane-dense slab.  n (coordinate count) is
    # small, so the lane splats + concat are a handful of XLU ops, fully
    # hidden under the HBM-write roofline of this memory-bound kernel.
    pieces = [jnp.broadcast_to(t[:, i:i + 1], (tb, dim)) for i in range(n)]
    t_exp = jnp.concatenate(pieces, axis=-1) if n > 1 else pieces[0]
    out_ref[...] = (t_exp * pat_ref[...]).astype(out_ref.dtype)


def _pick_block_rows(num_rows, row_bytes, target_bytes=4 * 1024 * 1024):
    """Rows per grid step: ~target_bytes output tile, sublane-aligned."""
    tb = max(1, min(num_rows, target_bytes // max(row_bytes, 1)))
    if tb >= num_rows:
        return num_rows
    tb = (tb // 8) * 8  # sub-block sublane dim must be a multiple of 8
    if tb < 8:
        return num_rows  # full extent is always a legal block
    return tb


def rotary_embedding(coordinates, inv_freq, *, min_freq=1.0 / 64, scale=1.0):
    """coordinates: (..., N) float array; inv_freq: (dim//2,). Returns (..., N, dim)."""
    lead = coordinates.shape[:-1]
    N = coordinates.shape[-1]
    half = inv_freq.shape[0]
    dim = 2 * half
    B = int(math.prod(lead)) if lead else 1

    coords = coordinates.reshape(B, N).astype(jnp.float32)
    # Fold scale/min_freq into the (tiny) frequency pattern and pre-tile it so
    # the kernel needs no concat and no per-element scaling of t.
    pat = jnp.concatenate([inv_freq, inv_freq]).astype(jnp.float32) * float(
        scale / min_freq
    )
    pat_tiled = jnp.tile(pat, N).reshape(1, N * dim)

    tb = _pick_block_rows(B, N * dim * 4)
    grid = (pl.cdiv(B, tb),)

    kernel = functools.partial(_rotary_kernel, dim=dim)

    out_flat = pl.pallas_call(
        kernel,
        out_shape=jax.ShapeDtypeStruct((B, N * dim), jnp.float32),
        grid=grid,
        in_specs=[
            pl.BlockSpec((tb, N), lambda i: (i, 0)),        # coordinate rows
            pl.BlockSpec((1, N * dim), lambda i: (0, 0)),   # constant pattern
        ],
        out_specs=pl.BlockSpec((tb, N * dim), lambda i: (i, 0)),
        compiler_params=pltpu.CompilerParams(
            dimension_semantics=("parallel",),
            vmem_limit_bytes=64 * 1024 * 1024,
        ),
        cost_estimate=pl.CostEstimate(
            flops=B * N * dim,
            transcendentals=0,
            bytes_accessed=4 * (B * N * dim + B * N + N * dim),
        ),
    )(coords, pat_tiled)

    # Free metadata reshape back to the module's (..., N, dim) output layout.
    return out_flat.reshape(*lead, N, dim)


def rotary_embedding_ref(coordinates, inv_freq, *, min_freq=1.0 / 64, scale=1.0):
    t = coordinates.astype(jnp.float32) * (scale / min_freq)
    freqs = jnp.einsum("...i,j->...ij", t, inv_freq.astype(jnp.float32))
    return jnp.concatenate([freqs, freqs], axis=-1)


if __name__ == "__main__":
    dim = 32            # rotary embedding dim
    min_freq = 1.0 / 64
    scale = 1.0

    # deterministic parameter init (matches nn.Module __init__)
    inv_freq = 1.0 / (10000.0 ** (jnp.arange(0, dim, 2, dtype=jnp.float32) / dim))

    # deterministic example inputs
    key = jax.random.PRNGKey(0)
    B, N = 2, 8
    coordinates = jax.random.uniform(key, (B, N), dtype=jnp.float32)

    out = rotary_embedding(coordinates, inv_freq, min_freq=min_freq, scale=scale)
    out = jax.block_until_ready(out)

    ref = rotary_embedding_ref(coordinates, inv_freq, min_freq=min_freq, scale=scale)
    assert out.shape == (B, N, dim), out.shape
    assert jnp.allclose(out, ref, atol=1e-5, rtol=1e-5), float(
        jnp.max(jnp.abs(out - ref))
    )

    print("KERNEL_OK")
</pallas_src>

<mosaic_0001>
module attributes {stable_mosaic.version = 11 : i64} {
  func.func @_rotary_kernel(%arg0: i32, %arg1: memref<2x8xf32, #tpu.memory_space<vmem>>, %arg2: memref<1x256xf32, #tpu.memory_space<vmem>>, %arg3: memref<2x256xf32, #tpu.memory_space<vmem>>) attributes {dimension_semantics = [#tpu.dimension_semantics<parallel>], iteration_bounds = array<i64: 1>, scalar_prefetch = 0 : i64, scratch_operands = 0 : i64, tpu.core_type = #tpu.core_type<tc>, window_params = [{transform_indices = @transform_0, window_bounds = array<i64: 2, 8>}, {pipeline_mode = #tpu.pipeline_mode<synchronous>, transform_indices = @transform_1, window_bounds = array<i64: 1, 256>}, {transform_indices = @transform_2, window_bounds = array<i64: 2, 256>}]} {
    %c0 = arith.constant 0 : index
    %c0_0 = arith.constant 0 : index
    %0 = vector.load %arg1[%c0, %c0_0] : memref<2x8xf32, #tpu.memory_space<vmem>>, vector<2x8xf32>
    %1 = vector.extract_strided_slice %0 {offsets = [0, 0], sizes = [2, 1], strides = [1, 1]} : vector<2x8xf32> to vector<2x1xf32>
    %2 = vector.shape_cast %1 : vector<2x1xf32> to vector<2x1xf32>
    %3 = vector.broadcast %2 : vector<2x1xf32> to vector<2x32xf32>
    %4 = vector.extract_strided_slice %0 {offsets = [0, 1], sizes = [2, 1], strides = [1, 1]} : vector<2x8xf32> to vector<2x1xf32>
    %5 = vector.shape_cast %4 : vector<2x1xf32> to vector<2x1xf32>
    %6 = vector.broadcast %5 : vector<2x1xf32> to vector<2x32xf32>
    %7 = vector.extract_strided_slice %0 {offsets = [0, 2], sizes = [2, 1], strides = [1, 1]} : vector<2x8xf32> to vector<2x1xf32>
    %8 = vector.shape_cast %7 : vector<2x1xf32> to vector<2x1xf32>
    %9 = vector.broadcast %8 : vector<2x1xf32> to vector<2x32xf32>
    %10 = vector.extract_strided_slice %0 {offsets = [0, 3], sizes = [2, 1], strides = [1, 1]} : vector<2x8xf32> to vector<2x1xf32>
    %11 = vector.shape_cast %10 : vector<2x1xf32> to vector<2x1xf32>
    %12 = vector.broadcast %11 : vector<2x1xf32> to vector<2x32xf32>
    %13 = vector.extract_strided_slice %0 {offsets = [0, 4], sizes = [2, 1], strides = [1, 1]} : vector<2x8xf32> to vector<2x1xf32>
    %14 = vector.shape_cast %13 : vector<2x1xf32> to vector<2x1xf32>
    %15 = vector.broadcast %14 : vector<2x1xf32> to vector<2x32xf32>
    %16 = vector.extract_strided_slice %0 {offsets = [0, 5], sizes = [2, 1], strides = [1, 1]} : vector<2x8xf32> to vector<2x1xf32>
    %17 = vector.shape_cast %16 : vector<2x1xf32> to vector<2x1xf32>
    %18 = vector.broadcast %17 : vector<2x1xf32> to vector<2x32xf32>
    %19 = vector.extract_strided_slice %0 {offsets = [0, 6], sizes = [2, 1], strides = [1, 1]} : vector<2x8xf32> to vector<2x1xf32>
    %20 = vector.shape_cast %19 : vector<2x1xf32> to vector<2x1xf32>
    %21 = vector.broadcast %20 : vector<2x1xf32> to vector<2x32xf32>
    %22 = vector.extract_strided_slice %0 {offsets = [0, 7], sizes = [2, 1], strides = [1, 1]} : vector<2x8xf32> to vector<2x1xf32>
    %23 = vector.shape_cast %22 : vector<2x1xf32> to vector<2x1xf32>
    %24 = vector.broadcast %23 : vector<2x1xf32> to vector<2x32xf32>
    %25 = tpu.concatenate %3, %6, %9, %12, %15, %18, %21, %24 in 1 : vector<2x32xf32>, vector<2x32xf32>, vector<2x32xf32>, vector<2x32xf32>, vector<2x32xf32>, vector<2x32xf32>, vector<2x32xf32>, vector<2x32xf32> -> vector<2x256xf32>
    %c0_1 = arith.constant 0 : index
    %c0_2 = arith.constant 0 : index
    %26 = vector.load %arg2[%c0_1, %c0_2] : memref<1x256xf32, #tpu.memory_space<vmem>>, vector<1x256xf32>
    %27 = vector.broadcast %26 : vector<1x256xf32> to vector<2x256xf32>
    %28 = arith.mulf %25, %27 : vector<2x256xf32>
    %c0_3 = arith.constant 0 : index
    %c0_4 = arith.constant 0 : index
    %29 = vector.load %arg3[%c0_3, %c0_4] : memref<2x256xf32, #tpu.memory_space<vmem>>, vector<2x256xf32>
    tpu.vector_store %arg3[%c0_3, %c0_4], %28 {strides = array<i32>} : memref<2x256xf32, #tpu.memory_space<vmem>>, vector<2x256xf32>,
    return
  }
  func.func @transform_0(%arg0: i32) -> (i32, i32) {
    %c0_i32 = arith.constant 0 : i32
    %c0_i32_0 = arith.constant 0 : i32
    return %arg0, %c0_i32 : i32, i32
  }
  func.func @transform_1(%arg0: i32) -> (i32, i32) {
    %c0_i32 = arith.constant 0 : i32
    %c0_i32_0 = arith.constant 0 : i32
    %c0_i32_1 = arith.constant 0 : i32
    return %c0_i32, %c0_i32_0 : i32, i32
  }
  func.func @transform_2(%arg0: i32) -> (i32, i32) {
    %c0_i32 = arith.constant 0 : i32
    %c0_i32_0 = arith.constant 0 : i32
    return %arg0, %c0_i32 : i32, i32
  }
}

</mosaic_0001>

<bundles_post_ra>
// kernel: tpu_custom_call.1
= control target key start
LH: loop header
LB: loop body
LE: loop exit
PB: predicated region body
PF: predicated region fallthrough
CT: control target
= control target key end

     0   :  { %7 = vsyncpa [#allocation3], 0  ;;  %s276_s0 = inlined_call_operand.hbm [shape: f32[2,8], index: 0, kind: input, shape index: {}]   ;;  %s277_s1 = inlined_call_operand.hbm [shape: f32[1,256], index: 1, kind: input, shape index: {}]   ;;  %s278_s2 = inlined_call_operand.hbm [shape: f32[2,256], index: 2, kind: output, shape index: {}]  }
   0x1   :  { %8 = vsyncpa [#allocation6], 0 }
   0x2   :  { %9 = vsyncpa [#allocation4], 0  ;;  %s214_s9 = smov [#allocation2]   ;;  %s215_s11 = smov [#allocation5]  }
   0x3   :  { %s16_s10 = sshll.u32 %s214_s9, 4  ;;  %s26_s12 = sshll.u32 %s215_s11, 4  ;;  %s17_s10 = int_to_ptr.vmem [resolvable:$true] %s16_s10  ;;  %s27_s12 = int_to_ptr.vmem [resolvable:$true] %s26_s12 }
   0x4   :  { %s142_s15 = scalar_lea.hbm %s276_s0, 32 }
   0x5   :  { %p143_p0 = scmp.ne.s32.totalorder %s276_s0, %s142_s15  ;;  %p146_p1 = scmp.lt.u32.totalorder %s142_s15, %s276_s0 }
   0x7   :  { %p148_p2 = pnand %p146_p1, %p143_p0 }
   0x9   :  { %151 = shalt.err (!%p148_p2)
}
   0xa   :  { %s152_s20 = scalar_lea.vmem %s17_s10, 32  ;;  %p157_p4 = scmp.lt.s32.totalorder %s17_s10, %s17_s10 }
   0xb   :  { %p153_p3 = scmp.ne.s32.totalorder %s17_s10, %s152_s20  ;;  %p158_p5 = scmp.lt.s32.totalorder %s152_s20, %s152_s20 }
   0xd   :  { %p159_p6 = por %p158_p5, %p157_p4 }
   0xf   :  { %p160_p7 = pnand %p159_p6, %p153_p3 }
  0x11   :  { %163 = shalt.err (!%p160_p7)
}
  0x12   :  { %19 = dma.hbm_to_vmem [thread:$0]  %s276_s0, 32, %s17_s10, [#allocation3]  }
  0x13   :  { %s164_s25 = scalar_lea.hbm %s277_s1, 32 }
  0x14   :  { %p165_p8 = scmp.ne.s32.totalorder %s277_s1, %s164_s25  ;;  %p168_p9 = scmp.lt.u32.totalorder %s164_s25, %s277_s1 }
  0x16   :  { %p170_p10 = pnand %p168_p9, %p165_p8 }
  0x18   :  { %173 = shalt.err (!%p170_p10)
}
  0x19   :  { %s174_s30 = scalar_lea.vmem %s27_s12, 32  ;;  %p179_p12 = scmp.lt.s32.totalorder %s27_s12, %s27_s12 }
  0x1a   :  { %p175_p11 = scmp.ne.s32.totalorder %s27_s12, %s174_s30  ;;  %p180_p13 = scmp.lt.s32.totalorder %s174_s30, %s174_s30 }
  0x1c   :  { %p181_p0 = por %p180_p13, %p179_p12 }
  0x1e   :  { %p182_p1 = pnand %p181_p0, %p175_p11 }
  0x20   :  { %185 = shalt.err (!%p182_p1)
}
  0x21   :  { %29 = dma.hbm_to_vmem [thread:$0]  %s277_s1, 32, %s27_s12, [#allocation6]  }
  0x22   :  { %208 = dma.done.wait [#allocation3], 32  }
  0x23   :  { %209 = vsyncadd [#allocation3], 4294967264 }
  0x24   :  { %210 = dma.done.wait [#allocation6], 32  }
  0x25   :  { %211 = vsyncadd [#allocation6], 4294967264  ;;  %v216_v0 = vmov 4   ;;  %v217_v1 = vmov 0   ;;  %v36_v2 = vld [vmem:[#allocation2] sm:$0x3]  ;;  %v81_v12 = vlaneseq }
  0x26   :  { %135 = vset.pattern.permute.xlu1 %v216_v0  ;;  %133 = vset.pattern.permute.xlu0 %v217_v1  ;;  %v218_v3 = vmov 5   ;;  %v219_v4 = vmov 1   ;;  %v220_v5 = vmov 2   ;;  %v221_v6 = vmov 6   ;;  %v79_v19 = vld [vmem:[#allocation5] sm:$0x3] }
  0x27   :  { %55 = vperm.xlu1 %135, %v36_v2   ;;  %39 = vperm.xlu0 %133, %v36_v2   ;;  %v222_v7 = vmov 3   ;;  %v223_v8 = vmov 7   ;;  %v82_v14 = vshrl.u32 %v81_v12, 7  ;;  %vm70_vm0 = vcmask 261120   ;;  %s224_s1 = smov [#allocation7]  }
  0x28   :  { %vm72_vm1 = vcmask 523264   ;;  %vm74_vm2 = vcmask 785408   ;;  %s111_s4 = sshll.u32 %s224_s1, 4  ;;  %s112_s4 = int_to_ptr.vmem [resolvable:$true] %s111_s4 }
  0x29   :  { %v83_v16 = vsub.s32 0, %v82_v14  ;;  %v87_v17 = vsub.s32 1, %v82_v14  ;;  %s186_s5 = scalar_lea.vmem %s112_s4, 64  ;;  %p191_p3 = scmp.lt.s32.totalorder %s112_s4, %s112_s4 }
  0x2a   :  { %p187_p2 = scmp.ne.s32.totalorder %s112_s4, %s186_s5  ;;  %p192_p4 = scmp.lt.s32.totalorder %s186_s5, %s186_s5 }
  0x2b   :  { %136 = vset.pattern.permute.xlu1 %v218_v3  ;;  %134 = vset.pattern.permute.xlu0 %v219_v4  ;;  %v84_v23 = vrot.slane %v79_v19, %v83_v16  ;;  %v88_v24 = vrot.slane %v79_v19, %v87_v17 }
  0x2c   :  { %59 = vperm.xlu1 %136, %v36_v2   ;;  %43 = vperm.xlu0 %134, %v36_v2   ;;  %p193_p5 = por %p192_p4, %p191_p3 }
  0x2e   :  { %p194_p6 = pnand %p193_p5, %p187_p2 }
  0x30   :  { %137 = vset.pattern.permute.xlu1 %v220_v5  ;;  %138 = vset.pattern.permute.xlu0 %v221_v6 }
  0x31   :  { %47 = vperm.xlu1 %137, %v36_v2   ;;  %63 = vperm.xlu0 %138, %v36_v2  }
  0x35   :  { %139 = vset.pattern.permute.xlu1 %v222_v7  ;;  %141 = vset.pattern.permute.xlu0 %v223_v8 }
  0x36   :  { %51 = vperm.xlu1 %139, %v36_v2  }
  0x3a   :  { %140 = vset.pattern.permute.xlu1 %v223_v8 }
  0x3b   :  { %67 = vperm.xlu1 %140, %v36_v2  }
  0xa6   :  { %v56_v9 = vpop.permute.xlu1 %55  ;;  %v40_v10 = vpop.permute.xlu0 %39 }
  0xab   :  { %v60_v11 = vpop.permute.xlu1 %59  ;;  %v44_v15 = vpop.permute.xlu0 %43 }
  0xac   :  { %v71_v18 = vsel %vm70_vm0, %v40_v10, %v44_v15  ;;  %v76_v25 = vsel %vm70_vm0, %v56_v9, %v60_v11 }
  0xb0   :  { %v48_v13 = vpop.permute.xlu1 %47  ;;  %v64_v21 = vpop.permute.xlu0 %63 }
  0xb1   :  { %v73_v22 = vsel %vm72_vm1, %v71_v18, %v48_v13  ;;  %v77_v27 = vsel %vm72_vm1, %v76_v25, %v64_v21 }
  0xb5   :  { %v52_v20 = vpop.permute.xlu1 %51 }
  0xb6   :  { %v75_v26 = vsel %vm74_vm2, %v73_v22, %v52_v20 }
  0xb7   :  { %v91_v30 = vmul.f32 %v84_v23, %v75_v26 }
  0xba   :  { %v68_v28 = vpop.permute.xlu1 %67 }
  0xbb   :  { %v78_v29 = vsel %vm74_vm2, %v77_v27, %v68_v28 }
  0xbc   :  { %v92_v31 = vmul.f32 %v88_v24, %v78_v29 }
  0xbe   :  { %v95_v32 = vcombine.low %v91_v30, %v92_v31 }
  0xc0   :  { %121 = vst.sshfl [vmem:[#allocation7] sm:$0x33 pattern:$0x76325410] %v95_v32 }
  0xc1   :  { %197 = shalt.err (!%p194_p6)
}
  0xc2   :  { %s198_s8 = scalar_lea.hbm %s278_s2, 64 }
  0xc3   :  { %p199_p7 = scmp.ne.s32.totalorder %s278_s2, %s198_s8  ;;  %p202_p8 = scmp.lt.u32.totalorder %s198_s8, %s278_s2 }
  0xc5   :  { %p204_p9 = pnand %p202_p8, %p199_p7 }
  0xc7   :  { %207 = shalt.err (!%p204_p9)
}
  0xc8   :  { %114 = dma.vmem_to_hbm [thread:$0]  %s112_s4, 64, %s278_s2, [#allocation4]  }
  0xc9   :  { %212 = dma.done.wait [#allocation4], 64  }
  0xca   :  { %213 = vsyncadd [#allocation4], 4294967232 }
  0xcb   :  { %118 = vsyncpa [#allocation3], 1 }
  0xcc   :  { %119 = vsyncpa [#allocation6], 1 }
  0xcd   :  { %120 = vsyncpa [#allocation4], 1 }

</bundles_post_ra>
